<compile_context>
chip_gen: v6e
topology: v6e:2x2x1
jax: 0.10.0
libtpu: 0.0.40
codegen_flags: <defaults>
</compile_context>

<pallas_src>
import math
import jax
import jax.numpy as jnp
from jax.experimental import pallas as pl
from jax.experimental.pallas import tpu as pltpu

# ------------------------- problem sizes (small, deterministic) --------------
S, B, E = 8, 2, 32          # seq, batch, embed_dim
H = 4                       # num_heads
DH = E // H                 # head_dim
G = B * H                   # fused (head, batch) attention batch
BS = B * S                  # tokens, M dimension of the lane-dense matmuls
MLP = 4 * E                 # mlp_ratio * embed_dim
EPS = 1e-5                  # nn.LayerNorm default eps
PREC = jax.lax.Precision.HIGHEST   # reference only


def _layer_norm(x, g, b):
    mu = jnp.mean(x, axis=-1, keepdims=True)
    var = jnp.mean(jnp.square(x - mu), axis=-1, keepdims=True)
    return (x - mu) * jax.lax.rsqrt(var + EPS) * g + b


def _gelu_tanh(x):
    # TODO(synk): PyTorch nn.GELU() uses exact erf; erf has no Mosaic lowering, so
    # the tanh approximation is used (|err| <= ~5e-4, covered by the tolerance).
    c = math.sqrt(2.0 / math.pi)
    return 0.5 * x * (1.0 + jnp.tanh(c * (x + 0.044715 * x * x * x)))


# ------------------------------- Pallas kernel -------------------------------
def encoder_kernel(x_ref, ln_ref, w_in_ref, b_in_ref, w_out_ref, w1_ref,
                   w2_ref, bias_ref, o_ref):
    bf16, f32 = jnp.bfloat16, jnp.float32
    x = x_ref[...]                                         # (B, S, E) f32
    ln = ln_ref[...]                                       # (4, E)    f32

    # ---- norm1 (f32 VPU/EUP math)
    xn = _layer_norm(x, ln[0:1, :], ln[1:2, :])            # (B, S, E)

    # ---- QKV projection: ONE lane-dense (B*S, E) @ (E, 3E) MXU matmul.
    qkv = jnp.dot(xn.reshape(BS, E).astype(bf16), w_in_ref[...],
                  preferred_element_type=f32) + b_in_ref[...]        # (BS, 3E)

    # ---- split (q/k/v, head) onto a leading batch axis: g = h*B + b.
    qkv3 = qkv.reshape(B, S, 3 * E)
    parts = [qkv3[:, :, j * DH:(j + 1) * DH] for j in range(3 * H)]
    qkvg = jnp.concatenate(parts, axis=0)                             # (3G, S, DH)
    q, k, v = qkvg[0:G], qkvg[G:2 * G], qkvg[2 * G:3 * G]             # (G, S, DH)

    # ---- scores / softmax / PV, batched over the fused (head, batch) axis.
    q16 = (q * (1.0 / math.sqrt(DH))).astype(bf16)         # fold scale into the cast
    s = jnp.einsum('gqd,gkd->gqk', q16, k.astype(bf16),
                   preferred_element_type=f32)                        # (G, S, S)
    s = s - jnp.max(s, axis=-1, keepdims=True)
    p = jnp.exp(s)
    p = p * pl.reciprocal(jnp.sum(p, axis=-1, keepdims=True), approx=True)
    o = jnp.einsum('gqk,gkd->gqd', p.astype(bf16), v.astype(bf16),
                   preferred_element_type=f32)                        # (G, S, DH)

    # ---- merge heads back onto the lane axis, ONE (B*S, E) @ (E, E) out-proj.
    attn_cat = jnp.concatenate([o[h * B:(h + 1) * B] for h in range(H)],
                               axis=-1)                               # (B, S, E)
    attn = jnp.dot(attn_cat.reshape(BS, E).astype(bf16), w_out_ref[...],
                   preferred_element_type=f32) + bias_ref[0:1, 0:E]   # (BS, E)
    x1 = x + attn.reshape(B, S, E)                                    # residual 1

    # ---- norm2 + MLP (Linear -> GELU -> Linear), batch folded into M = B*S.
    yn = _layer_norm(x1, ln[2:3, :], ln[3:4, :])
    h1 = jnp.dot(yn.reshape(BS, E).astype(bf16), w1_ref[...],
                 preferred_element_type=f32) + bias_ref[1:2, :]       # (BS, MLP)
    h1 = _gelu_tanh(h1)
    h2 = jnp.dot(h1.astype(bf16), w2_ref[...],
                 preferred_element_type=f32) + bias_ref[2:3, 0:E]     # (BS, E)

    o_ref[...] = x1 + h2.reshape(B, S, E)                             # residual 2


# ------------------------------- wrapper --------------------------------------
def transformer_encoder(x_sbe, params):
    """x_sbe: (S, B, E) float32 (PyTorch seq-first layout)."""
    bf16 = jnp.bfloat16
    x_bse = jnp.transpose(x_sbe, (1, 0, 2))                           # (B, S, E)

    # LayerNorm params packed: rows = [ln1_g, ln1_b, ln2_g, ln2_b]
    ln = jnp.concatenate([params["ln1_g"], params["ln1_b"],
                          params["ln2_g"], params["ln2_b"]], axis=0)  # (4, E)

    # Row biases packed into one lane-padded array: rows = [b_out, b1, b2].
    def _row(v):
        v = v.reshape(1, -1)
        return jnp.pad(v, ((0, 0), (0, MLP - v.shape[1])))
    bias_pack = jnp.concatenate([_row(params["b_out"]), _row(params["b1"]),
                                 _row(params["b2"])], axis=0)         # (3, MLP)

    vmem = pl.BlockSpec(memory_space=pltpu.MemorySpace.VMEM)
    out_bse = pl.pallas_call(
        encoder_kernel,
        out_shape=jax.ShapeDtypeStruct((B, S, E), jnp.float32),
        in_specs=[vmem] * 8,
        out_specs=vmem,
    )(x_bse, ln,
      params["w_in"].astype(bf16),   # (E, 3E)  un-broadcast
      params["b_in"],                # (1, 3E)  f32
      params["w_out"].astype(bf16),  # (E, E)
      params["w1"].astype(bf16),     # (E, MLP)
      params["w2"].astype(bf16),     # (MLP, E)
      bias_pack)
    return jnp.transpose(out_bse, (1, 0, 2))                          # back to (S, B, E)


# --------------------------- deterministic params ------------------------------
def init_params(key):
    ks = jax.random.split(key, 10)

    def u(k, shape, fan_in):
        bound = 1.0 / math.sqrt(fan_in)
        return jax.random.uniform(k, shape, jnp.float32, -bound, bound)

    # Linear weights stored pre-transposed as (in, out) so the math is x @ W.
    return dict(
        ln1_g=jnp.ones((1, E), jnp.float32),
        ln1_b=jnp.zeros((1, E), jnp.float32),
        w_in=u(ks[0], (E, 3 * E), E),          # attn in_proj  (E -> 3E)
        b_in=u(ks[1], (1, 3 * E), E),
        w_out=u(ks[2], (E, E), E),             # attn out_proj (E -> E)
        b_out=u(ks[3], (1, E), E),
        ln2_g=jnp.ones((1, E), jnp.float32),
        ln2_b=jnp.zeros((1, E), jnp.float32),
        w1=u(ks[4], (E, MLP), E),              # mlp fc1 (E -> 4E)
        b1=u(ks[5], (1, MLP), E),
        w2=u(ks[6], (MLP, E), MLP),            # mlp fc2 (4E -> E)
        b2=u(ks[7], (1, E), MLP),
    )


# --------------------------- pure-JAX reference (exact f32) --------------------
def reference(x_sbe, p):
    def one(xb):                                               # xb: (S, E)
        xn = _layer_norm(xb, p["ln1_g"], p["ln1_b"])
        qkv = jnp.dot(xn, p["w_in"], precision=PREC) + p["b_in"]
        q, k, v = jnp.split(qkv, 3, axis=-1)
        q = q.reshape(S, H, DH).transpose(1, 0, 2)
        k = k.reshape(S, H, DH).transpose(1, 0, 2)
        v = v.reshape(S, H, DH).transpose(1, 0, 2)
        s = jnp.einsum("hqd,hkd->hqk", q, k, precision=PREC) / math.sqrt(DH)
        a = jax.nn.softmax(s, axis=-1)
        o = jnp.einsum("hqk,hkd->hqd", a, v, precision=PREC)
        o = o.transpose(1, 0, 2).reshape(S, E)
        o = jnp.dot(o, p["w_out"], precision=PREC) + p["b_out"]
        x1 = xb + o
        yn = _layer_norm(x1, p["ln2_g"], p["ln2_b"])
        h = jnp.dot(yn, p["w1"], precision=PREC) + p["b1"]
        h = jax.nn.gelu(h, approximate=False)                  # exact erf GELU
        h = jnp.dot(h, p["w2"], precision=PREC) + p["b2"]
        return x1 + h
    return jax.vmap(one, in_axes=1, out_axes=1)(x_sbe)


if __name__ == "__main__":
    key = jax.random.PRNGKey(0)
    kx, kp = jax.random.split(key)
    x = jax.random.normal(kx, (S, B, E), jnp.float32)          # (seq, batch, embed)
    params = init_params(kp)

    out = transformer_encoder(x, params)
    out = jax.block_until_ready(out)

    ref = reference(x, params)
    assert out.shape == (S, B, E)
    err = float(jnp.max(jnp.abs(out - ref)))
    # Tolerance accounts for the documented perf approximations vs. the exact-f32
    # reference: bf16 MXU operands (f32 accumulation), tanh-GELU and the approx
    # softmax reciprocal — observed error is a few 1e-3; 2e-2 still catches any
    # structural bug (wrong head packing / layernorm / weight layout).
    if err < 2e-2:
        print("KERNEL_OK")
    else:
        print(f"mismatch: max abs err = {err}")
</pallas_src>

<mosaic_0001>
module attributes {stable_mosaic.version = 11 : i64} {
  func.func @encoder_kernel(%arg0: memref<2x8x32xf32, #tpu.memory_space<vmem>>, %arg1: memref<4x32xf32, #tpu.memory_space<vmem>>, %arg2: memref<32x96xbf16, #tpu.memory_space<vmem>>, %arg3: memref<1x96xf32, #tpu.memory_space<vmem>>, %arg4: memref<32x32xbf16, #tpu.memory_space<vmem>>, %arg5: memref<32x128xbf16, #tpu.memory_space<vmem>>, %arg6: memref<128x32xbf16, #tpu.memory_space<vmem>>, %arg7: memref<3x128xf32, #tpu.memory_space<vmem>>, %arg8: memref<2x8x32xf32, #tpu.memory_space<vmem>>) attributes {dimension_semantics = [], scalar_prefetch = 0 : i64, scratch_operands = 0 : i64, tpu.core_type = #tpu.core_type<tc>} {
    %c0 = arith.constant 0 : index
    %c0_0 = arith.constant 0 : index
    %c0_1 = arith.constant 0 : index
    %0 = vector.load %arg0[%c0, %c0_0, %c0_1] : memref<2x8x32xf32, #tpu.memory_space<vmem>>, vector<2x8x32xf32>
    %c0_2 = arith.constant 0 : index
    %c0_3 = arith.constant 0 : index
    %1 = vector.load %arg1[%c0_2, %c0_3] : memref<4x32xf32, #tpu.memory_space<vmem>>, vector<4x32xf32>
    %2 = vector.extract_strided_slice %1 {offsets = [0, 0], sizes = [1, 32], strides = [1, 1]} : vector<4x32xf32> to vector<1x32xf32>
    %3 = vector.extract_strided_slice %1 {offsets = [1, 0], sizes = [1, 32], strides = [1, 1]} : vector<4x32xf32> to vector<1x32xf32>
    %cst = arith.constant dense<0.000000e+00> : vector<2x8xf32>
    %4 = vector.multi_reduction <add>, %0, %cst [2] : vector<2x8x32xf32> to vector<2x8xf32>
    %5 = vector.shape_cast %4 : vector<2x8xf32> to vector<2x8x1xf32>
    %cst_4 = arith.constant 3.200000e+01 : f32
    %6 = vector.broadcast %cst_4 : f32 to vector<2x8x1xf32>
    %7 = arith.divf %5, %6 : vector<2x8x1xf32>
    %8 = vector.broadcast %7 : vector<2x8x1xf32> to vector<2x8x32xf32>
    %9 = arith.subf %0, %8 : vector<2x8x32xf32>
    %10 = arith.mulf %9, %9 : vector<2x8x32xf32>
    %cst_5 = arith.constant dense<0.000000e+00> : vector<2x8xf32>
    %11 = vector.multi_reduction <add>, %10, %cst_5 [2] : vector<2x8x32xf32> to vector<2x8xf32>
    %12 = vector.shape_cast %11 : vector<2x8xf32> to vector<2x8x1xf32>
    %cst_6 = arith.constant 3.200000e+01 : f32
    %13 = vector.broadcast %cst_6 : f32 to vector<2x8x1xf32>
    %14 = arith.divf %12, %13 : vector<2x8x1xf32>
    %15 = vector.broadcast %7 : vector<2x8x1xf32> to vector<2x8x32xf32>
    %16 = arith.subf %0, %15 : vector<2x8x32xf32>
    %cst_7 = arith.constant 9.99999974E-6 : f32
    %17 = vector.broadcast %cst_7 : f32 to vector<2x8x1xf32>
    %18 = arith.addf %14, %17 : vector<2x8x1xf32>
    %19 = math.rsqrt %18 : vector<2x8x1xf32>
    %20 = vector.broadcast %19 : vector<2x8x1xf32> to vector<2x8x32xf32>
    %21 = arith.mulf %16, %20 : vector<2x8x32xf32>
    %22 = vector.shape_cast %2 : vector<1x32xf32> to vector<1x1x32xf32>
    %23 = vector.broadcast %22 : vector<1x1x32xf32> to vector<2x8x32xf32>
    %24 = arith.mulf %21, %23 : vector<2x8x32xf32>
    %25 = vector.shape_cast %3 : vector<1x32xf32> to vector<1x1x32xf32>
    %26 = vector.broadcast %25 : vector<1x1x32xf32> to vector<2x8x32xf32>
    %27 = arith.addf %24, %26 : vector<2x8x32xf32>
    %28 = vector.shape_cast %27 : vector<2x8x32xf32> to vector<16x32xf32>
    %29 = arith.truncf %28 : vector<16x32xf32> to vector<16x32xbf16>
    %c0_8 = arith.constant 0 : index
    %c0_9 = arith.constant 0 : index
    %30 = vector.load %arg2[%c0_8, %c0_9] : memref<32x96xbf16, #tpu.memory_space<vmem>>, vector<32x96xbf16>
    %cst_10 = arith.constant dense<0.000000e+00> : vector<16x96xf32>
    %31 = tpu.matmul %29, %30, %cst_10 {dimension_numbers = #tpu.dot_dimension_numbers<[1], [0], [0], [1], [0, 0, 1, 1], [], []>} : vector<16x32xbf16>, vector<32x96xbf16>, vector<16x96xf32> -> vector<16x96xf32>
    %c0_11 = arith.constant 0 : index
    %c0_12 = arith.constant 0 : index
    %32 = vector.load %arg3[%c0_11, %c0_12] : memref<1x96xf32, #tpu.memory_space<vmem>>, vector<1x96xf32>
    %33 = vector.broadcast %32 : vector<1x96xf32> to vector<16x96xf32>
    %34 = arith.addf %31, %33 : vector<16x96xf32>
    %35 = vector.shape_cast %34 : vector<16x96xf32> to vector<2x8x96xf32>
    %36 = vector.extract_strided_slice %35 {offsets = [0, 0, 0], sizes = [2, 8, 8], strides = [1, 1, 1]} : vector<2x8x96xf32> to vector<2x8x8xf32>
    %37 = vector.extract_strided_slice %35 {offsets = [0, 0, 8], sizes = [2, 8, 8], strides = [1, 1, 1]} : vector<2x8x96xf32> to vector<2x8x8xf32>
    %38 = vector.extract_strided_slice %35 {offsets = [0, 0, 16], sizes = [2, 8, 8], strides = [1, 1, 1]} : vector<2x8x96xf32> to vector<2x8x8xf32>
    %39 = vector.extract_strided_slice %35 {offsets = [0, 0, 24], sizes = [2, 8, 8], strides = [1, 1, 1]} : vector<2x8x96xf32> to vector<2x8x8xf32>
    %40 = vector.extract_strided_slice %35 {offsets = [0, 0, 32], sizes = [2, 8, 8], strides = [1, 1, 1]} : vector<2x8x96xf32> to vector<2x8x8xf32>
    %41 = vector.extract_strided_slice %35 {offsets = [0, 0, 40], sizes = [2, 8, 8], strides = [1, 1, 1]} : vector<2x8x96xf32> to vector<2x8x8xf32>
    %42 = vector.extract_strided_slice %35 {offsets = [0, 0, 48], sizes = [2, 8, 8], strides = [1, 1, 1]} : vector<2x8x96xf32> to vector<2x8x8xf32>
    %43 = vector.extract_strided_slice %35 {offsets = [0, 0, 56], sizes = [2, 8, 8], strides = [1, 1, 1]} : vector<2x8x96xf32> to vector<2x8x8xf32>
    %44 = vector.extract_strided_slice %35 {offsets = [0, 0, 64], sizes = [2, 8, 8], strides = [1, 1, 1]} : vector<2x8x96xf32> to vector<2x8x8xf32>
    %45 = vector.extract_strided_slice %35 {offsets = [0, 0, 72], sizes = [2, 8, 8], strides = [1, 1, 1]} : vector<2x8x96xf32> to vector<2x8x8xf32>
    %46 = vector.extract_strided_slice %35 {offsets = [0, 0, 80], sizes = [2, 8, 8], strides = [1, 1, 1]} : vector<2x8x96xf32> to vector<2x8x8xf32>
    %47 = vector.extract_strided_slice %35 {offsets = [0, 0, 88], sizes = [2, 8, 8], strides = [1, 1, 1]} : vector<2x8x96xf32> to vector<2x8x8xf32>
    %48 = tpu.concatenate %36, %37, %38, %39, %40, %41, %42, %43, %44, %45, %46, %47 in 0 : vector<2x8x8xf32>, vector<2x8x8xf32>, vector<2x8x8xf32>, vector<2x8x8xf32>, vector<2x8x8xf32>, vector<2x8x8xf32>, vector<2x8x8xf32>, vector<2x8x8xf32>, vector<2x8x8xf32>, vector<2x8x8xf32>, vector<2x8x8xf32>, vector<2x8x8xf32> -> vector<24x8x8xf32>
    %49 = vector.extract_strided_slice %48 {offsets = [0, 0, 0], sizes = [8, 8, 8], strides = [1, 1, 1]} : vector<24x8x8xf32> to vector<8x8x8xf32>
    %50 = vector.extract_strided_slice %48 {offsets = [8, 0, 0], sizes = [8, 8, 8], strides = [1, 1, 1]} : vector<24x8x8xf32> to vector<8x8x8xf32>
    %51 = vector.extract_strided_slice %48 {offsets = [16, 0, 0], sizes = [8, 8, 8], strides = [1, 1, 1]} : vector<24x8x8xf32> to vector<8x8x8xf32>
    %cst_13 = arith.constant 0.353553385 : f32
    %52 = vector.broadcast %cst_13 : f32 to vector<8x8x8xf32>
    %53 = arith.mulf %49, %52 : vector<8x8x8xf32>
    %54 = arith.truncf %53 : vector<8x8x8xf32> to vector<8x8x8xbf16>
    %55 = arith.truncf %50 : vector<8x8x8xf32> to vector<8x8x8xbf16>
    "tpu.trace_start"() <{level = 10 : i32, message = "gqd,gkd->gqk"}> : () -> ()
    %cst_14 = arith.constant dense<0.000000e+00> : vector<8x8x8xf32>
    %56 = tpu.matmul %54, %55, %cst_14 {dimension_numbers = #tpu.dot_dimension_numbers<[2], [2], [1], [1], [0, 0, 0, 1, 1, 1], [0], [0]>} : vector<8x8x8xbf16>, vector<8x8x8xbf16>, vector<8x8x8xf32> -> vector<8x8x8xf32>
    "tpu.trace_stop"() : () -> ()
    %cst_15 = arith.constant dense<0xFF800000> : vector<8x8xf32>
    %57 = vector.multi_reduction <maximumf>, %56, %cst_15 [2] : vector<8x8x8xf32> to vector<8x8xf32>
    %58 = vector.shape_cast %57 : vector<8x8xf32> to vector<8x8x1xf32>
    %59 = vector.broadcast %58 : vector<8x8x1xf32> to vector<8x8x8xf32>
    %60 = arith.subf %56, %59 : vector<8x8x8xf32>
    %61 = math.exp %60 : vector<8x8x8xf32>
    %cst_16 = arith.constant dense<0.000000e+00> : vector<8x8xf32>
    %62 = vector.multi_reduction <add>, %61, %cst_16 [2] : vector<8x8x8xf32> to vector<8x8xf32>
    %63 = vector.shape_cast %62 : vector<8x8xf32> to vector<8x8x1xf32>
    %64 = tpu.reciprocal %63 {approx = true} : vector<8x8x1xf32> -> vector<8x8x1xf32>
    %65 = vector.broadcast %64 : vector<8x8x1xf32> to vector<8x8x8xf32>
    %66 = arith.mulf %61, %65 : vector<8x8x8xf32>
    %67 = arith.truncf %66 : vector<8x8x8xf32> to vector<8x8x8xbf16>
    %68 = arith.truncf %51 : vector<8x8x8xf32> to vector<8x8x8xbf16>
    "tpu.trace_start"() <{level = 10 : i32, message = "gqk,gkd->gqd"}> : () -> ()
    %cst_17 = arith.constant dense<0.000000e+00> : vector<8x8x8xf32>
    %69 = tpu.matmul %67, %68, %cst_17 {dimension_numbers = #tpu.dot_dimension_numbers<[2], [1], [1], [2], [0, 0, 0, 1, 1, 2], [0], [0]>} : vector<8x8x8xbf16>, vector<8x8x8xbf16>, vector<8x8x8xf32> -> vector<8x8x8xf32>
    "tpu.trace_stop"() : () -> ()
    %70 = vector.extract_strided_slice %69 {offsets = [0, 0, 0], sizes = [2, 8, 8], strides = [1, 1, 1]} : vector<8x8x8xf32> to vector<2x8x8xf32>
    %71 = vector.extract_strided_slice %69 {offsets = [2, 0, 0], sizes = [2, 8, 8], strides = [1, 1, 1]} : vector<8x8x8xf32> to vector<2x8x8xf32>
    %72 = vector.extract_strided_slice %69 {offsets = [4, 0, 0], sizes = [2, 8, 8], strides = [1, 1, 1]} : vector<8x8x8xf32> to vector<2x8x8xf32>
    %73 = vector.extract_strided_slice %69 {offsets = [6, 0, 0], sizes = [2, 8, 8], strides = [1, 1, 1]} : vector<8x8x8xf32> to vector<2x8x8xf32>
    %74 = tpu.concatenate %70, %71, %72, %73 in 2 : vector<2x8x8xf32>, vector<2x8x8xf32>, vector<2x8x8xf32>, vector<2x8x8xf32> -> vector<2x8x32xf32>
    %75 = vector.shape_cast %74 : vector<2x8x32xf32> to vector<16x32xf32>
    %76 = arith.truncf %75 : vector<16x32xf32> to vector<16x32xbf16>
    %c0_18 = arith.constant 0 : index
    %c0_19 = arith.constant 0 : index
    %77 = vector.load %arg4[%c0_18, %c0_19] : memref<32x32xbf16, #tpu.memory_space<vmem>>, vector<32x32xbf16>
    %cst_20 = arith.constant dense<0.000000e+00> : vector<16x32xf32>
    %78 = tpu.matmul %76, %77, %cst_20 {dimension_numbers = #tpu.dot_dimension_numbers<[1], [0], [0], [1], [0, 0, 1, 1], [], []>} : vector<16x32xbf16>, vector<32x32xbf16>, vector<16x32xf32> -> vector<16x32xf32>
    %c0_21 = arith.constant 0 : index
    %c0_22 = arith.constant 0 : index
    %79 = vector.load %arg7[%c0_21, %c0_22] : memref<3x128xf32, #tpu.memory_space<vmem>>, vector<1x32xf32>
    %80 = vector.broadcast %79 : vector<1x32xf32> to vector<16x32xf32>
    %81 = arith.addf %78, %80 : vector<16x32xf32>
    %82 = vector.shape_cast %81 : vector<16x32xf32> to vector<2x8x32xf32>
    %83 = arith.addf %0, %82 : vector<2x8x32xf32>
    %84 = vector.extract_strided_slice %1 {offsets = [2, 0], sizes = [1, 32], strides = [1, 1]} : vector<4x32xf32> to vector<1x32xf32>
    %85 = vector.extract_strided_slice %1 {offsets = [3, 0], sizes = [1, 32], strides = [1, 1]} : vector<4x32xf32> to vector<1x32xf32>
    %cst_23 = arith.constant dense<0.000000e+00> : vector<2x8xf32>
    %86 = vector.multi_reduction <add>, %83, %cst_23 [2] : vector<2x8x32xf32> to vector<2x8xf32>
    %87 = vector.shape_cast %86 : vector<2x8xf32> to vector<2x8x1xf32>
    %cst_24 = arith.constant 3.200000e+01 : f32
    %88 = vector.broadcast %cst_24 : f32 to vector<2x8x1xf32>
    %89 = arith.divf %87, %88 : vector<2x8x1xf32>
    %90 = vector.broadcast %89 : vector<2x8x1xf32> to vector<2x8x32xf32>
    %91 = arith.subf %83, %90 : vector<2x8x32xf32>
    %92 = arith.mulf %91, %91 : vector<2x8x32xf32>
    %cst_25 = arith.constant dense<0.000000e+00> : vector<2x8xf32>
    %93 = vector.multi_reduction <add>, %92, %cst_25 [2] : vector<2x8x32xf32> to vector<2x8xf32>
    %94 = vector.shape_cast %93 : vector<2x8xf32> to vector<2x8x1xf32>
    %cst_26 = arith.constant 3.200000e+01 : f32
    %95 = vector.broadcast %cst_26 : f32 to vector<2x8x1xf32>
    %96 = arith.divf %94, %95 : vector<2x8x1xf32>
    %97 = vector.broadcast %89 : vector<2x8x1xf32> to vector<2x8x32xf32>
    %98 = arith.subf %83, %97 : vector<2x8x32xf32>
    %cst_27 = arith.constant 9.99999974E-6 : f32
    %99 = vector.broadcast %cst_27 : f32 to vector<2x8x1xf32>
    %100 = arith.addf %96, %99 : vector<2x8x1xf32>
    %101 = math.rsqrt %100 : vector<2x8x1xf32>
    %102 = vector.broadcast %101 : vector<2x8x1xf32> to vector<2x8x32xf32>
    %103 = arith.mulf %98, %102 : vector<2x8x32xf32>
    %104 = vector.shape_cast %84 : vector<1x32xf32> to vector<1x1x32xf32>
    %105 = vector.broadcast %104 : vector<1x1x32xf32> to vector<2x8x32xf32>
    %106 = arith.mulf %103, %105 : vector<2x8x32xf32>
    %107 = vector.shape_cast %85 : vector<1x32xf32> to vector<1x1x32xf32>
    %108 = vector.broadcast %107 : vector<1x1x32xf32> to vector<2x8x32xf32>
    %109 = arith.addf %106, %108 : vector<2x8x32xf32>
    %110 = vector.shape_cast %109 : vector<2x8x32xf32> to vector<16x32xf32>
    %111 = arith.truncf %110 : vector<16x32xf32> to vector<16x32xbf16>
    %c0_28 = arith.constant 0 : index
    %c0_29 = arith.constant 0 : index
    %112 = vector.load %arg5[%c0_28, %c0_29] : memref<32x128xbf16, #tpu.memory_space<vmem>>, vector<32x128xbf16>
    %cst_30 = arith.constant dense<0.000000e+00> : vector<16x128xf32>
    %113 = tpu.matmul %111, %112, %cst_30 {dimension_numbers = #tpu.dot_dimension_numbers<[1], [0], [0], [1], [0, 0, 1, 1], [], []>} : vector<16x32xbf16>, vector<32x128xbf16>, vector<16x128xf32> -> vector<16x128xf32>
    %c1 = arith.constant 1 : index
    %c0_31 = arith.constant 0 : index
    %114 = vector.load %arg7[%c1, %c0_31] : memref<3x128xf32, #tpu.memory_space<vmem>>, vector<1x128xf32>
    %115 = vector.broadcast %114 : vector<1x128xf32> to vector<16x128xf32>
    %116 = arith.addf %113, %115 : vector<16x128xf32>
    %cst_32 = arith.constant 5.000000e-01 : f32
    %117 = vector.broadcast %cst_32 : f32 to vector<16x128xf32>
    %118 = arith.mulf %117, %116 : vector<16x128xf32>
    %cst_33 = arith.constant 4.471500e-02 : f32
    %119 = vector.broadcast %cst_33 : f32 to vector<16x128xf32>
    %120 = arith.mulf %119, %116 : vector<16x128xf32>
    %121 = arith.mulf %120, %116 : vector<16x128xf32>
    %122 = arith.mulf %121, %116 : vector<16x128xf32>
    %123 = arith.addf %116, %122 : vector<16x128xf32>
    %cst_34 = arith.constant 0.797884583 : f32
    %124 = vector.broadcast %cst_34 : f32 to vector<16x128xf32>
    %125 = arith.mulf %124, %123 : vector<16x128xf32>
    %126 = math.tanh %125 : vector<16x128xf32>
    %cst_35 = arith.constant 1.000000e+00 : f32
    %127 = vector.broadcast %cst_35 : f32 to vector<16x128xf32>
    %128 = arith.addf %127, %126 : vector<16x128xf32>
    %129 = arith.mulf %118, %128 : vector<16x128xf32>
    %130 = arith.truncf %129 : vector<16x128xf32> to vector<16x128xbf16>
    %c0_36 = arith.constant 0 : index
    %c0_37 = arith.constant 0 : index
    %131 = vector.load %arg6[%c0_36, %c0_37] : memref<128x32xbf16, #tpu.memory_space<vmem>>, vector<128x32xbf16>
    %cst_38 = arith.constant dense<0.000000e+00> : vector<16x32xf32>
    %132 = tpu.matmul %130, %131, %cst_38 {dimension_numbers = #tpu.dot_dimension_numbers<[1], [0], [0], [1], [0, 0, 1, 1], [], []>} : vector<16x128xbf16>, vector<128x32xbf16>, vector<16x32xf32> -> vector<16x32xf32>
    %c2 = arith.constant 2 : index
    %c0_39 = arith.constant 0 : index
    %133 = vector.load %arg7[%c2, %c0_39] : memref<3x128xf32, #tpu.memory_space<vmem>>, vector<1x32xf32>
    %134 = vector.broadcast %133 : vector<1x32xf32> to vector<16x32xf32>
    %135 = arith.addf %132, %134 : vector<16x32xf32>
    %136 = vector.shape_cast %135 : vector<16x32xf32> to vector<2x8x32xf32>
    %137 = arith.addf %83, %136 : vector<2x8x32xf32>
    %c0_40 = arith.constant 0 : index
    %c0_41 = arith.constant 0 : index
    %c0_42 = arith.constant 0 : index
    %138 = vector.load %arg8[%c0_40, %c0_41, %c0_42] : memref<2x8x32xf32, #tpu.memory_space<vmem>>, vector<2x8x32xf32>
    tpu.vector_store %arg8[%c0_40, %c0_41, %c0_42], %137 {strides = array<i32>} : memref<2x8x32xf32, #tpu.memory_space<vmem>>, vector<2x8x32xf32>,
    return
  }
}

</mosaic_0001>

<bundles_post_ra>
// kernel: tpu_custom_call.1
= control target key start
LH: loop header
LB: loop body
LE: loop exit
PB: predicated region body
PF: predicated region fallthrough
CT: control target
= control target key end

     0   :  { %vm34_vm0 = vcmask 261120   ;;  %s2137_s0 = inlined_call_operand.vmem [shape: f32[2,8,32], index: 0, kind: input, shape index: {}]   ;;  %s2138_s1 = inlined_call_operand.vmem [shape: f32[4,32], index: 1, kind: input, shape index: {}]   ;;  %s2139_s2 = inlined_call_operand.vmem [shape: bf16[32,96], index: 2, kind: input, shape index: {}]   ;;  %s2140_s3 = inlined_call_operand.vmem [shape: f32[1,96], index: 3, kind: input, shape index: {}]   ;;  %s2141_s4 = inlined_call_operand.vmem [shape: bf16[32,32], index: 4, kind: input, shape index: {}]   ;;  %s2142_s5 = inlined_call_operand.vmem [shape: bf16[32,128], index: 5, kind: input, shape index: {}]   ;;  %s2143_s6 = inlined_call_operand.vmem [shape: bf16[128,32], index: 6, kind: input, shape index: {}]   ;;  %s2144_s7 = inlined_call_operand.vmem [shape: f32[3,128], index: 7, kind: input, shape index: {}]   ;;  %s2145_s8 = inlined_call_operand.hbm [shape: f32[2,8,32], index: 8, kind: output, shape index: {}]  }
   0x1   :  { %v1870_v0 = vld [vmem:[%s2137_s0] sm:$0xff]  ;;  %v1875_v1 = vld [vmem:[%s2137_s0 + $0x8] sm:$0xff] }
   0x2   :  { %v35_v2 = vsel %vm34_vm0, %v1870_v0, 0.0  ;;  %v38_v3 = vsel %vm34_vm0, %v1875_v1, 0.0 }
   0x3   :  { %36 = vadd.xlane.f32.xlu0 %v35_v2 }
   0x7   :  { %39 = vadd.xlane.f32.xlu0 %v38_v3 }
   0x8   :  { %13 = vsyncpa [#allocation3], 0  ;;  %v1724_v14 = vld [vmem:[%s2139_s2 + $0x8] sm:$0xff]   ;;  %v1804_v15 = vmov 0.0   ;;  %vm1805_vm1 = vmmov 0   ;;  %v1725_v16 = vld [vmem:[%s2139_s2] sm:$0xff]   ;;  %v62_v23 = vlaneseq }
   0x9   :  { %1516 = vmatprep.subr.bf16.mxu0 %v1804_v15  ;;  %1520 = vmatprep.mubr.msk.bf16.mxu0 %vm1805_vm1, %v1804_v15  ;;  %v1905_v26 = vld [vmem:[%s2138_s1] sm:$0xf]  ;;  %s1806_s14 = smov 96   ;;  %s1807_s15 = smov 120   ;;  %vm234_vm2 = vcmask 64512   ;;  %vm710_vm3 = vcmask 1043456  }
   0xa   :  { %1517 = vmatpush3.bf16.msra.mxu0 %v1724_v14  ;;  %1536 = vmatprep.subr.bf16.mxu1 %v1804_v15  ;;  %v1899_v24 = vshrl.u32 %v62_v23, 7  ;;  %v1429_v39 = vld [vmem:[%s2140_s3] ss:$0 sm:$0xff]  ;;  %s1808_s16 = smov 112   ;;  %s1809_s17 = smov 88   ;;  %vm1102_vm4 = vcmask 130048  }
   0xb   :  { %1518 = vmatprep.subr.bf16.mxu0 %v1804_v15  ;;  %1538 = vmatprep.mubr.msk.bf16.mxu1 %vm1805_vm1, %v1804_v15  ;;  %s1810_s18 = smov 72   ;;  %s1811_s3 = smov 104   ;;  %vm1105_vm5 = vcmask 195584  }
   0xc   :  { %v64_v25 = vsub.s32 0, %v1899_v24  ;;  %v70_v30 = vsub.s32 1, %v1899_v24  ;;  %s1812_s19 = smov 80   ;;  %s1813_s20 = smov 64  }
   0xd   :  { %s1814_s21 = smov 48   ;;  %s1815_s22 = smov 40  }
   0xe   :  { %1519 = vmatpush3.bf16.msra.mxu0 %v1725_v16  ;;  %v65_v29 = vrot.slane %v1905_v26, %v64_v25  ;;  %v71_v34 = vrot.slane %v1905_v26, %v70_v30  ;;  %s1816_s23 = smov 56   ;;  %s1817_s26 = smov 8  }
   0xf   :  { %1524 = vmatprep.subr.bf16.mxu0 %v1804_v15  ;;  %s1818_s29 = smov 16  }
  0x8c   :  { %v37_v4 = vpop.xlane.xlu0 %36 }
  0x8d   :  { %v42_v5 = vmul.f32 0.03125, %v37_v4 }
  0x8f   :  { %v44_v6 = vsub.f32 %v1870_v0, %v42_v5 }
  0x90   :  { %v40_v7 = vpop.xlane.xlu0 %39 }
  0x91   :  { %v43_v8 = vmul.f32 0.03125, %v40_v7  ;;  %v46_v9 = vmul.f32 %v44_v6, %v44_v6 }
  0x93   :  { %v45_v10 = vsub.f32 %v1875_v1, %v43_v8  ;;  %v48_v11 = vsel %vm34_vm0, %v46_v9, 0.0 }
  0x94   :  { %49 = vadd.xlane.f32.xlu1 %v48_v11 }
  0x95   :  { %v47_v12 = vmul.f32 %v45_v10, %v45_v10 }
  0x97   :  { %v51_v13 = vsel %vm34_vm0, %v47_v12, 0.0 }
  0x98   :  { %52 = vadd.xlane.f32.xlu1 %v51_v13 }
 0x11d   :  { %v50_v17 = vpop.xlane.xlu1 %49 }
 0x11e   :  { %v54_v18 = vmul.f32 0.03125, %v50_v17 }
 0x120   :  { %v56_v19 = vadd.f32 1e-05, %v54_v18 }
 0x121   :  { %v53_v20 = vpop.xlane.xlu1 %52 }
 0x122   :  { %1738 = vrsqrt.f32 %v56_v19  ;;  %v55_v21 = vmul.f32 0.03125, %v53_v20 }
 0x124   :  { %v57_v22 = vadd.f32 1e-05, %v55_v21 }
 0x126   :  { %1740 = vrsqrt.f32 %v57_v22 }
 0x12f   :  { %v1739_v27 = vpop.eup %1738 }
 0x130   :  { %v60_v28 = vmul.f32 %v1739_v27, %v44_v6 }
 0x132   :  { %v66_v33 = vmul.f32 %v65_v29, %v60_v28 }
 0x133   :  { %v1741_v31 = vpop.eup %1740 }
 0x134   :  { %v61_v32 = vmul.f32 %v1741_v31, %v45_v10  ;;  %v72_v36 = vadd.f32 %v71_v34, %v66_v33 }
 0x136   :  { %v67_v35 = vmul.f32 %v65_v29, %v61_v32 }
 0x138   :  { %v73_v37 = vadd.f32 %v71_v34, %v67_v35 }
 0x13a   :  { %v74_v38 = vpack.c.bf16 %v73_v37, %v72_v36 }
 0x13c   :  { %1521 = vmatmul.mubr.msk.bf16.vlgmr.msra.gmra.mxu0 %vm34_vm0, %v74_v38 }
 0x13d   :  { %1526 = vmatprep.mubr.msk.bf16.mxu0 %vm1805_vm1, %v1804_v15 }
 0x1fc   :  { %v135_v40 = vpop.f32.mrf.mxu0 }
 0x1fd   :  { %v136_v41 = vadd.f32 %v1429_v39, %v135_v40 }
 0x1fe   :  { %v1522_v42 = vpop.f32.mrf.mxu0 }
 0x1ff   :  { %162 = vrot.lane.b32.xlu0 %v136_v41, %s1806_s14  ;;  %v210_v51 = vmul.f32 0.35355338, %v136_v41 }
 0x200   :  { %v138_v43 = vpop.f32.mrf.mxu0 }
 0x201   :  { %v139_v44 = vadd.f32 %v1429_v39, %v138_v43  ;;  %v218_v56 = vpack.c.bf16 %v210_v51, %v210_v51 }
 0x202   :  { %v1523_v45 = vpop.f32.mrf.mxu0 }
 0x203   :  { %146 = vrot.lane.b32.xlu0 %v139_v44, %s1807_s15  ;;  %164 = vrot.lane.b32.xlu1 %v139_v44, %s1806_s14  ;;  %v1916_v46 = vpack.i.bf16 %v139_v44, %v136_v41  ;;  %v211_v63 = vmul.f32 0.35355338, %v139_v44 }
 0x205   :  { %v219_v6 = vpack.c.bf16 %v211_v63, %v211_v63 }
 0x207   :  { %150 = vrot.lane.b32.xlu0 %v136_v41, %s1808_s16  ;;  %1675 = vrot.lane.b32.xlu1 %v1916_v46, %s1809_s17 }
 0x20b   :  { %1685 = vrot.lane.b32.xlu0 %v1916_v46, %s1810_s18  ;;  %144 = vrot.lane.b32.xlu1 %v136_v41, %s1807_s15 }
 0x20f   :  { %158 = vrot.lane.b32.xlu0 %v139_v44, %s1811_s3  ;;  %1680 = vrot.lane.b32.xlu1 %v1916_v46, %s1812_s19 }
 0x213   :  { %152 = vrot.lane.b32.xlu1 %v139_v44, %s1808_s16 }
 0x217   :  { %156 = vrot.lane.b32.xlu1 %v136_v41, %s1811_s3 }
 0x271   :  { %v163_v47 = vpop.permute.xlu0 %162 }
 0x272   :  { %v226_v48 = vpack.c.bf16 %v163_v47, %v163_v47 }
 0x274   :  { %v239_v49 = vsel %vm234_vm2, %v226_v48, 0 }
 0x275   :  { %1525 = vmatpush3.bf16.xpose.msra.mxu0 %v239_v49  ;;  %v165_v50 = vpop.permute.xlu1 %164  ;;  %v147_v52 = vpop.permute.xlu0 %146 }
 0x276   :  { %1530 = vmatprep.subr.bf16.mxu0 %v1804_v15  ;;  %v227_v53 = vpack.c.bf16 %v165_v50, %v165_v50  ;;  %v213_v12 = vmul.f32 0.35355338, %v147_v52 }
 0x278   :  { %v285_v57 = vsel %vm234_vm2, %v227_v53, 0  ;;  %v221_v19 = vpack.c.bf16 %v213_v12, %v213_v12 }
 0x279   :  { %v1676_v54 = vpop.permute.xlu1 %1675  ;;  %v151_v60 = vpop.permute.xlu0 %150 }
 0x27a   :  { %v1677_v55 = vunpack.i.l.bf16 %v1676_v54  ;;  %v1678_v58 = vunpack.i.h.bf16 %v1676_v54  ;;  %v214_v17 = vmul.f32 0.35355338, %v151_v60 }
 0x27c   :  { %v228_v59 = vpack.c.bf16 %v1677_v55, %v1677_v55  ;;  %1527 = vmatmul.mubr.msk.bf16.vlgmr.msra.gmra.mxu0 %vm234_vm2, %v218_v56  ;;  %v229_v2 = vpack.c.bf16 %v1678_v58, %v1678_v58  ;;  %v222_v21 = vpack.c.bf16 %v214_v17, %v214_v17 }
 0x27d   :  { %1531 = vmatpush3.bf16.xpose.msra.mxu0 %v285_v57  ;;  %v145_v61 = vpop.permute.xlu1 %144  ;;  %1532 = vmatprep.mubr.msk.bf16.mxu0 %vm1805_vm1, %v1804_v15  ;;  %v1686_v7 = vpop.permute.xlu0 %1685 }
 0x27e   :  { %v331_v62 = vsel %vm234_vm2, %v228_v59, 0  ;;  %1542 = vmatprep.subr.bf16.mxu0 %v1804_v15  ;;  %v212_v3 = vmul.f32 0.35355338, %v145_v61  ;;  %v377_v11 = vsel %vm234_vm2, %v229_v2, 0  ;;  %v1687_v13 = vunpack.i.l.bf16 %v1686_v7 }
 0x27f   :  { %1537 = vmatpush3.bf16.xpose.msra.mxu1 %v331_v62  ;;  %v1688_v22 = vunpack.i.h.bf16 %v1686_v7 }
 0x280   :  { %1548 = vmatprep.subr.bf16.mxu1 %v1804_v15  ;;  %v220_v8 = vpack.c.bf16 %v212_v3, %v212_v3  ;;  %v232_v20 = vpack.c.bf16 %v1687_v13, %v1687_v13 }
 0x281   :  { %v1681_v4 = vpop.permute.xlu1 %1680  ;;  %v233_v29 = vpack.c.bf16 %v1688_v22, %v1688_v22  ;;  %v159_v32 = vpop.permute.xlu0 %158 }
 0x282   :  { %v1682_v5 = vunpack.i.l.bf16 %v1681_v4  ;;  %v1683_v9 = vunpack.i.h.bf16 %v1681_v4  ;;  %v515_v28 = vsel %vm234_vm2, %v232_v20, 0  ;;  %v217_v35 = vmul.f32 0.35355338, %v159_v32 }
 0x283   :  { %v561_v34 = vsel %vm234_vm2, %v233_v29, 0 }
 0x284   :  { %v230_v10 = vpack.c.bf16 %v1682_v5, %v1682_v5  ;;  %1533 = vmatmul.mubr.msk.bf16.vlgmr.msra.gmra.mxu0 %vm234_vm2, %v219_v6  ;;  %v231_v18 = vpack.c.bf16 %v1683_v9, %v1683_v9  ;;  %v225_v36 = vpack.c.bf16 %v217_v35, %v217_v35 }
 0x285   :  { %1543 = vmatpush3.bf16.xpose.msra.mxu0 %v377_v11  ;;  %1544 = vmatprep.mubr.msk.bf16.mxu0 %vm1805_vm1, %v1804_v15  ;;  %v153_v16 = vpop.permute.xlu1 %152 }
 0x286   :  { %1539 = vmatmul.mubr.msk.bf16.vlgmr.msra.gmra.mxu1 %vm234_vm2, %v220_v8  ;;  %v423_v14 = vsel %vm234_vm2, %v230_v10, 0  ;;  %1554 = vmatprep.subr.bf16.mxu0 %v1804_v15  ;;  %v469_v23 = vsel %vm234_vm2, %v231_v18, 0  ;;  %v215_v27 = vmul.f32 0.35355338, %v153_v16 }
 0x287   :  { %1549 = vmatpush3.bf16.xpose.msra.mxu1 %v423_v14  ;;  %1550 = vmatprep.mubr.msk.bf16.mxu1 %vm1805_vm1, %v1804_v15 }
 0x288   :  { %1560 = vmatprep.subr.bf16.mxu1 %v1804_v15  ;;  %v223_v31 = vpack.c.bf16 %v215_v27, %v215_v27 }
 0x289   :  { %v157_v25 = vpop.permute.xlu1 %156 }
 0x28a   :  { %v216_v30 = vmul.f32 0.35355338, %v157_v25 }
 0x28c   :  { %1545 = vmatmul.mubr.msk.bf16.vlgmr.msra.gmra.mxu0 %vm234_vm2, %v221_v19  ;;  %v224_v33 = vpack.c.bf16 %v216_v30, %v216_v30 }
 0x28d   :  { %1555 = vmatpush3.bf16.xpose.msra.mxu0 %v469_v23  ;;  %1556 = vmatprep.mubr.msk.bf16.mxu0 %vm1805_vm1, %v1804_v15 }
 0x28e   :  { %1551 = vmatmul.mubr.msk.bf16.vlgmr.msra.gmra.mxu1 %vm234_vm2, %v222_v21  ;;  %1566 = vmatprep.subr.bf16.mxu0 %v1804_v15 }
 0x28f   :  { %1561 = vmatpush3.bf16.xpose.msra.mxu1 %v515_v28  ;;  %1562 = vmatprep.mubr.msk.bf16.mxu1 %vm1805_vm1, %v1804_v15 }
 0x290   :  { %1572 = vmatprep.subr.bf16.mxu1 %v1804_v15 }
 0x294   :  { %1557 = vmatmul.mubr.msk.bf16.vlgmr.msra.gmra.mxu0 %vm234_vm2, %v223_v31 }
 0x295   :  { %1567 = vmatpush3.bf16.xpose.msra.mxu0 %v561_v34  ;;  %1568 = vmatprep.mubr.msk.bf16.mxu0 %vm1805_vm1, %v1804_v15 }
 0x296   :  { %1563 = vmatmul.mubr.msk.bf16.vlgmr.msra.gmra.mxu1 %vm234_vm2, %v224_v33  ;;  %1578 = vmatprep.subr.bf16.mxu0 %v1804_v15 }
 0x297   :  { %1574 = vmatprep.mubr.msk.bf16.mxu1 %vm1805_vm1, %v1804_v15 }
 0x29c   :  { %1569 = vmatmul.mubr.msk.bf16.vlgmr.msra.gmra.mxu0 %vm234_vm2, %v225_v36 }
 0x29d   :  { %1580 = vmatprep.mubr.msk.bf16.mxu0 %vm1805_vm1, %v1804_v15 }
 0x33c   :  { %v275_v37 = vpop.f32.mrf.mxu0 }
 0x33d   :  { %v603_v38 = vsel %vm234_vm2, %v275_v37, -inf }
 0x33e   :  { %604 = vmax.xlane.f32.xlu1 %v603_v38  ;;  %v1528_v39 = vpop.f32.mrf.mxu0 }
 0x340   :  { %v278_v40 = vpop.f32.mrf.mxu0 }
 0x342   :  { %v1529_v41 = vpop.f32.mrf.mxu0 }
 0x344   :  { %v321_v42 = vpop.f32.mrf.mxu0 }
 0x345   :  { %v606_v43 = vsel %vm234_vm2, %v321_v42, -inf }
 0x346   :  { %v367_v44 = vpop.f32.mrf.mxu1  ;;  %607 = vmax.xlane.f32.xlu0 %v606_v43  ;;  %v1534_v45 = vpop.f32.mrf.mxu0 }
 0x347   :  { %v609_v49 = vsel %vm234_vm2, %v367_v44, -inf }
 0x348   :  { %v324_v47 = vpop.f32.mrf.mxu0  ;;  %v1540_v48 = vpop.f32.mrf.mxu1 }
 0x34a   :  { %v370_v50 = vpop.f32.mrf.mxu1  ;;  %610 = vmax.xlane.f32.xlu0 %v609_v49  ;;  %v1535_v51 = vpop.f32.mrf.mxu0 }
 0x34c   :  { %v1541_v52 = vpop.f32.mrf.mxu1  ;;  %v413_v53 = vpop.f32.mrf.mxu0 }
 0x34d   :  { %v612_v54 = vsel %vm234_vm2, %v413_v53, -inf }
 0x34e   :  { %v459_v55 = vpop.f32.mrf.mxu1  ;;  %613 = vmax.xlane.f32.xlu0 %v612_v54  ;;  %v1546_v56 = vpop.f32.mrf.mxu0 }
 0x34f   :  { %v615_v57 = vsel %vm234_vm2, %v459_v55, -inf }
 0x350   :  { %v1552_v58 = vpop.f32.mrf.mxu1  ;;  %616 = vmax.xlane.f32.xlu1 %v615_v57  ;;  %v416_v59 = vpop.f32.mrf.mxu0 }
 0x352   :  { %v1547_v60 = vpop.f32.mrf.mxu0  ;;  %v462_v61 = vpop.f32.mrf.mxu1 }
 0x354   :  { %v1553_v62 = vpop.f32.mrf.mxu1  ;;  %v505_v63 = vpop.f32.mrf.mxu0 }
 0x355   :  { %v618_v2 = vsel %vm234_vm2, %v505_v63, -inf }
 0x356   :  { %v551_v3 = vpop.f32.mrf.mxu1  ;;  %619 = vmax.xlane.f32.xlu0 %v618_v2  ;;  %v1558_v4 = vpop.f32.mrf.mxu0 }
 0x357   :  { %v621_v5 = vsel %vm234_vm2, %v551_v3, -inf }
 0x358   :  { %v1564_v6 = vpop.f32.mrf.mxu1  ;;  %622 = vmax.xlane.f32.xlu1 %v621_v5  ;;  %v508_v7 = vpop.f32.mrf.mxu0 }
 0x35a   :  { %v1559_v8 = vpop.f32.mrf.mxu0  ;;  %v554_v9 = vpop.f32.mrf.mxu1 }
 0x35c   :  { %v1565_v10 = vpop.f32.mrf.mxu1  ;;  %v597_v11 = vpop.f32.mrf.mxu0 }
 0x35d   :  { %v624_v12 = vsel %vm234_vm2, %v597_v11, -inf }
 0x35e   :  { %625 = vmax.xlane.f32.xlu0 %v624_v12  ;;  %v1570_v13 = vpop.f32.mrf.mxu0 }
 0x360   :  { %v600_v14 = vpop.f32.mrf.mxu0 }
 0x362   :  { %v1571_v16 = vpop.f32.mrf.mxu0 }
 0x369   :  { %1690 = vrot.lane.b32.xlu1 %v1916_v46, %s1813_s20 }
 0x3c7   :  { %v605_v17 = vpop.xlane.xlu1 %604 }
 0x3c8   :  { %v627_v18 = vsub.f32 %v275_v37, %v605_v17 }
 0x3ca   :  { %v635_v19 = vmul.f32 1.442695, %v627_v18 }
 0x3cc   :  { %1742 = vpow2.f32 %v635_v19 }
 0x3cf   :  { %v608_v20 = vpop.xlane.xlu0 %607 }
 0x3d0   :  { %v628_v21 = vsub.f32 %v321_v42, %v608_v20 }
 0x3d2   :  { %v637_v22 = vmul.f32 1.442695, %v628_v21 }
 0x3d3   :  { %v611_v23 = vpop.xlane.xlu0 %610 }
 0x3d4   :  { %1744 = vpow2.f32 %v637_v22  ;;  %v629_v25 = vsub.f32 %v367_v44, %v611_v23 }
 0x3d6   :  { %v639_v27 = vmul.f32 1.442695, %v629_v25 }
 0x3d7   :  { %v614_v28 = vpop.xlane.xlu0 %613 }
 0x3d8   :  { %1746 = vpow2.f32 %v639_v27  ;;  %v630_v29 = vsub.f32 %v413_v53, %v614_v28 }
 0x3d9   :  { %v1970_v30 = vpop.eup %1742  ;;  %v617_v31 = vpop.xlane.xlu1 %616 }
 0x3da   :  { %v641_v32 = vmul.f32 1.442695, %v630_v29  ;;  %v631_v33 = vsub.f32 %v459_v55, %v617_v31  ;;  %v651_v34 = vsel %vm234_vm2, %v1970_v30, 0.0 }
 0x3db   :  { %652 = vadd.xlane.f32.xlu1 %v651_v34 }
 0x3dc   :  { %1748 = vpow2.f32 %v641_v32  ;;  %v643_v35 = vmul.f32 1.442695, %v631_v33 }
 0x3de   :  { %1750 = vpow2.f32 %v643_v35 }
 0x3df   :  { %v620_v36 = vpop.xlane.xlu0 %619 }
 0x3e0   :  { %v632_v37 = vsub.f32 %v505_v63, %v620_v36 }
 0x3e1   :  { %v1745_v38 = vpop.eup %1744  ;;  %v623_v39 = vpop.xlane.xlu1 %622 }
 0x3e2   :  { %v633_v40 = vsub.f32 %v551_v3, %v623_v39  ;;  %v654_v41 = vsel %vm234_vm2, %v1745_v38, 0.0  ;;  %v645_v42 = vmul.f32 1.442695, %v632_v37 }
 0x3e3   :  { %655 = vadd.xlane.f32.xlu0 %v654_v41 }
 0x3e4   :  { %v647_v43 = vmul.f32 1.442695, %v633_v40 }
 0x3e5   :  { %v1975_v44 = vpop.eup %1746  ;;  %v1691_v45 = vpop.permute.xlu1 %1690 }
 0x3e6   :  { %1752 = vpow2.f32 %v647_v43  ;;  %v1693_v47 = vunpack.i.h.bf16 %v1691_v45  ;;  %v1692_v48 = vunpack.i.l.bf16 %v1691_v45  ;;  %v657_v49 = vsel %vm234_vm2, %v1975_v44, 0.0 }
 0x3e7   :  { %658 = vadd.xlane.f32.xlu1 %v657_v49  ;;  %v626_v50 = vpop.xlane.xlu0 %625  ;;  %1754 = vpow2.f32 %v645_v42 }
 0x3e8   :  { %v700_v51 = vpack.c.bf16 %v1693_v47, %v1693_v47  ;;  %v699_v52 = vpack.c.bf16 %v1692_v48, %v1692_v48  ;;  %v634_v53 = vsub.f32 %v597_v11, %v626_v50 }
 0x3e9   :  { %v1979_v54 = vpop.eup %1748 }
 0x3ea   :  { %v649_v55 = vmul.f32 1.442695, %v634_v53  ;;  %v712_v56 = vsel %vm710_vm3, %v699_v52, 0  ;;  %v758_v57 = vsel %vm710_vm3, %v700_v51, 0  ;;  %v660_v58 = vsel %vm234_vm2, %v1979_v54, 0.0 }
 0x3eb   :  { %v1985_v59 = vpop.eup %1750  ;;  %1573 = vmatpush3.bf16.msra.mxu1 %v712_v56  ;;  %1579 = vmatpush3.bf16.msra.mxu0 %v758_v57 }
 0x3ec   :  { %1756 = vpow2.f32 %v649_v55  ;;  %661 = vadd.xlane.f32.xlu0 %v660_v58  ;;  %v663_v60 = vsel %vm234_vm2, %v1985_v59, 0.0  ;;  %1584 = vmatprep.subr.bf16.mxu1 %v1804_v15 }
 0x3ed   :  { %664 = vadd.xlane.f32.xlu1 %v663_v60  ;;  %1590 = vmatprep.subr.bf16.mxu0 %v1804_v15 }
 0x3f3   :  { %v1991_v61 = vpop.eup %1752 }
 0x3f4   :  { %v669_v62 = vsel %vm234_vm2, %v1991_v61, 0.0  ;;  %v1995_v63 = vpop.eup %1754 }
 0x3f5   :  { %670 = vadd.xlane.f32.xlu0 %v669_v62  ;;  %v666_v2 = vsel %vm234_vm2, %v1995_v63, 0.0 }
 0x3f9   :  { %v1999_v3 = vpop.eup %1756  ;;  %667 = vadd.xlane.f32.xlu0 %v666_v2 }
 0x3fa   :  { %v672_v4 = vsel %vm234_vm2, %v1999_v3, 0.0 }
 0x3fd   :  { %673 = vadd.xlane.f32.xlu0 %v672_v4 }
 0x3fe   :  { %1700 = vrot.lane.b32.xlu1 %v1916_v46, %s1814_s21 }
 0x402   :  { %1705 = vrot.lane.b32.xlu1 %v1916_v46, %s1815_s22 }
 0x413   :  { %1695 = vrot.lane.b32.xlu0 %v1916_v46, %s1816_s23 }
 0x464   :  { %v653_v5 = vpop.xlane.xlu1 %652 }
 0x465   :  { %1758 = vrcp.f32 %v653_v5 }
 0x46c   :  { %v656_v6 = vpop.xlane.xlu0 %655 }
 0x46d   :  { %1760 = vrcp.f32 %v656_v6 }
 0x470   :  { %v659_v10 = vpop.xlane.xlu1 %658 }
 0x471   :  { %1762 = vrcp.f32 %v659_v10 }
 0x472   :  { %v1759_v7 = vpop.eup %1758 }
 0x473   :  { %v683_v8 = vmul.f32 %v1759_v7, %v1970_v30 }
 0x475   :  { %v691_v9 = vpack.c.bf16 %v683_v8, %v683_v8  ;;  %v662_v12 = vpop.xlane.xlu0 %661 }
 0x476   :  { %1764 = vrcp.f32 %v662_v12  ;;  %v665_v16 = vpop.xlane.xlu1 %664 }
 0x477   :  { %1575 = vmatmul.mubr.msk.bf16.vlgmr.msra.gmra.mxu1 %vm234_vm2, %v691_v9  ;;  %1766 = vrcp.f32 %v665_v16  ;;  %v1726_v9 = vld [vmem:[%s2141_s4 + $0x8] sm:$0xff]  }
 0x478   :  { %1586 = vmatprep.mubr.msk.bf16.mxu1 %vm1805_vm1, %v1804_v15 }
 0x47a   :  { %v1761_v11 = vpop.eup %1760  ;;  %v1701_v19 = vpop.permute.xlu1 %1700 }
 0x47b   :  { %v684_v13 = vmul.f32 %v1761_v11, %v1745_v38  ;;  %v1703_v23 = vunpack.i.h.bf16 %v1701_v19  ;;  %v1702_v25 = vunpack.i.l.bf16 %v1701_v19 }
 0x47d   :  { %v692_v46 = vpack.c.bf16 %v684_v13, %v684_v13  ;;  %v704_v33 = vpack.c.bf16 %v1703_v23, %v1703_v23  ;;  %v703_v34 = vpack.c.bf16 %v1702_v25, %v1702_v25 }
 0x47e   :  { %v671_v14 = vpop.xlane.xlu0 %670  ;;  %v1763_v20 = vpop.eup %1762 }
 0x47f   :  { %1581 = vmatmul.mubr.msk.bf16.vlgmr.msra.gmra.mxu0 %vm234_vm2, %v692_v46  ;;  %v685_v29 = vmul.f32 %v1763_v20, %v1975_v44  ;;  %v1706_v37 = vpop.permute.xlu1 %1705  ;;  %v896_v44 = vsel %vm710_vm3, %v703_v34, 0  ;;  %v942_v45 = vsel %vm710_vm3, %v704_v33, 0 }
 0x480   :  { %1592 = vmatprep.mubr.msk.bf16.mxu0 %vm1805_vm1, %v1804_v15  ;;  %v1708_v42 = vunpack.i.h.bf16 %v1706_v37  ;;  %v1707_v43 = vunpack.i.l.bf16 %v1706_v37 }
 0x481   :  { %v693_v39 = vpack.c.bf16 %v685_v29, %v685_v29 }
 0x482   :  { %v668_v17 = vpop.xlane.xlu0 %667  ;;  %v706_v49 = vpack.c.bf16 %v1708_v42, %v1708_v42  ;;  %v705_v50 = vpack.c.bf16 %v1707_v43, %v1707_v43 }
 0x483   :  { %1768 = vrcp.f32 %v668_v17  ;;  %v1765_v21 = vpop.eup %1764  ;;  %v1727_v17 = vld [vmem:[%s2141_s4] sm:$0xff]   ;;  %s1819_s4 = smov 24  }
 0x484   :  { %1770 = vrcp.f32 %v671_v14  ;;  %v686_v32 = vmul.f32 %v1765_v21, %v1979_v54  ;;  %v1767_v38 = vpop.eup %1766  ;;  %v988_v55 = vsel %vm710_vm3, %v705_v50, 0  ;;  %v1034_v56 = vsel %vm710_vm3, %v706_v49, 0 }
 0x485   :  { %v687_v47 = vmul.f32 %v1767_v38, %v1985_v59 }
 0x486   :  { %v674_v18 = vpop.xlane.xlu0 %673  ;;  %v694_v40 = vpack.c.bf16 %v686_v32, %v686_v32 }
 0x487   :  { %1772 = vrcp.f32 %v674_v18  ;;  %v695_v52 = vpack.c.bf16 %v687_v47, %v687_v47 }
 0x48a   :  { %v1696_v22 = vpop.permute.xlu0 %1695 }
 0x48b   :  { %v1698_v27 = vunpack.i.h.bf16 %v1696_v22  ;;  %v1697_v28 = vunpack.i.l.bf16 %v1696_v22 }
 0x48d   :  { %v702_v30 = vpack.c.bf16 %v1698_v27, %v1698_v27  ;;  %v701_v31 = vpack.c.bf16 %v1697_v28, %v1697_v28 }
 0x48f   :  { %v804_v35 = vsel %vm710_vm3, %v701_v31, 0  ;;  %v850_v36 = vsel %vm710_vm3, %v702_v30, 0 }
 0x490   :  { %1585 = vmatpush3.bf16.msra.mxu1 %v804_v35  ;;  %1591 = vmatpush3.bf16.msra.mxu0 %v850_v36  ;;  %v1769_v41 = vpop.eup %1768 }
 0x491   :  { %1596 = vmatprep.subr.bf16.mxu1 %v1804_v15  ;;  %1602 = vmatprep.subr.bf16.mxu0 %v1804_v15  ;;  %v688_v48 = vmul.f32 %v1769_v41, %v1995_v63  ;;  %v1771_v51 = vpop.eup %1770 }
 0x492   :  { %v689_v57 = vmul.f32 %v1771_v51, %v1991_v61 }
 0x493   :  { %1587 = vmatmul.mubr.msk.bf16.vlgmr.msra.gmra.mxu1 %vm234_vm2, %v693_v39  ;;  %1593 = vmatmul.mubr.msk.bf16.vlgmr.msra.gmra.mxu0 %vm234_vm2, %v694_v40  ;;  %v696_v53 = vpack.c.bf16 %v688_v48, %v688_v48 }
 0x494   :  { %1597 = vmatpush3.bf16.msra.mxu1 %v896_v44  ;;  %1603 = vmatpush3.bf16.msra.mxu0 %v942_v45  ;;  %v1773_v54 = vpop.eup %1772  ;;  %v697_v59 = vpack.c.bf16 %v689_v57, %v689_v57 }
 0x495   :  { %1598 = vmatprep.mubr.msk.bf16.mxu1 %vm1805_vm1, %v1804_v15  ;;  %1604 = vmatprep.mubr.msk.bf16.mxu0 %vm1805_vm1, %v1804_v15  ;;  %v690_v58 = vmul.f32 %v1773_v54, %v1999_v3 }
 0x496   :  { %1608 = vmatprep.subr.bf16.mxu1 %v1804_v15  ;;  %1614 = vmatprep.subr.bf16.mxu0 %v1804_v15 }
 0x497   :  { %v698_v60 = vpack.c.bf16 %v690_v58, %v690_v58 }
 0x49b   :  { %1599 = vmatmul.mubr.msk.bf16.vlgmr.msra.gmra.mxu1 %vm234_vm2, %v695_v52  ;;  %1605 = vmatmul.mubr.msk.bf16.vlgmr.msra.gmra.mxu0 %vm234_vm2, %v696_v53 }
 0x49c   :  { %1609 = vmatpush3.bf16.msra.mxu1 %v988_v55  ;;  %1615 = vmatpush3.bf16.msra.mxu0 %v1034_v56  ;;  %v1449_v55 = vld [vmem:[%s2144_s7] ss:$0 sm:$0xff] }
 0x49d   :  { %1610 = vmatprep.mubr.msk.bf16.mxu1 %vm1805_vm1, %v1804_v15  ;;  %1616 = vmatprep.mubr.msk.bf16.mxu0 %vm1805_vm1, %v1804_v15 }
 0x49e   :  { %1620 = vmatprep.subr.bf16.mxu1 %v1804_v15  ;;  %1628 = vmatprep.subr.bf16.mxu0 %v1804_v15 }
 0x4a3   :  { %1611 = vmatmul.mubr.msk.bf16.vlgmr.msra.gmra.mxu1 %vm234_vm2, %v697_v59  ;;  %1617 = vmatmul.mubr.msk.bf16.vlgmr.msra.gmra.mxu0 %vm234_vm2, %v698_v60 }
 0x4a4   :  { %1624 = vmatprep.mubr.msk.bf16.mxu1 %vm1805_vm1, %v1804_v15  ;;  %1632 = vmatprep.mubr.msk.bf16.mxu0 %vm1805_vm1, %v1804_v15 }
 0x4a5   :  { %1621 = vmatpush3.bf16.msra.mxu1 %v1726_v9 }
 0x4a6   :  { %1622 = vmatprep.subr.bf16.mxu1 %v1804_v15 }
 0x4a9   :  { %1623 = vmatpush3.bf16.msra.mxu1 %v1727_v17 }
 0x4aa   :  { %1636 = vmatprep.subr.bf16.mxu1 %v1804_v15 }
 0x537   :  { %v748_v62 = vpop.f32.mrf.mxu1 }
 0x539   :  { %v1576_v61 = vpop.f32.mrf.mxu1 }
 0x53b   :  { %v751_v63 = vpop.f32.mrf.mxu1 }
 0x53d   :  { %v1577_v2 = vpop.f32.mrf.mxu1 }
 0x53f   :  { %v794_v3 = vpop.f32.mrf.mxu0 }
 0x541   :  { %v1582_v4 = vpop.f32.mrf.mxu0 }
 0x543   :  { %v797_v5 = vpop.f32.mrf.mxu0 }
 0x545   :  { %v1583_v6 = vpop.f32.mrf.mxu0 }
 0x553   :  { %v840_v7 = vpop.f32.mrf.mxu1  ;;  %v886_v8 = vpop.f32.mrf.mxu0 }
 0x554   :  { %v1709_v10 = vpack.i.bf16 %v886_v8, %v840_v7 }
 0x555   :  { %v1588_v11 = vpop.f32.mrf.mxu1  ;;  %v1594_v12 = vpop.f32.mrf.mxu0 }
 0x556   :  { %1710 = vrot.lane.b32.xlu1 %v1709_v10, %s1817_s26  ;;  %v1728_v12 = vld [vmem:[%s2142_s5 + $0x8] sm:$0xff]  }
 0x557   :  { %v843_v13 = vpop.f32.mrf.mxu1  ;;  %v889_v46 = vpop.f32.mrf.mxu0  ;;  %1629 = vmatpush3.bf16.msra.mxu0 %v1728_v12 }
 0x558   :  { %v1729_v13 = vld [vmem:[%s2142_s5] sm:$0xff]   ;;  %1630 = vmatprep.subr.bf16.mxu0 %v1804_v15 }
 0x559   :  { %v1589_v14 = vpop.f32.mrf.mxu1  ;;  %v1595_v16 = vpop.f32.mrf.mxu0 }
 0x55b   :  { %v932_v18 = vpop.f32.mrf.mxu1  ;;  %v978_v19 = vpop.f32.mrf.mxu0  ;;  %1631 = vmatpush3.bf16.msra.mxu0 %v1729_v13 }
 0x55c   :  { %v1714_v20 = vpack.i.bf16 %v978_v19, %v932_v18 }
 0x55d   :  { %v1600_v21 = vpop.f32.mrf.mxu1  ;;  %v1606_v22 = vpop.f32.mrf.mxu0 }
 0x55e   :  { %1715 = vrot.lane.b32.xlu1 %v1714_v20, %s1818_s29  ;;  %v1204_v20 = vsub.s32 2, %v1899_v24  ;;  %s1820_s29 = smov [#allocation2]  }
 0x55f   :  { %v935_v23 = vpop.f32.mrf.mxu1  ;;  %v981_v25 = vpop.f32.mrf.mxu0 }
 0x560   :  { %v1205_v23 = vrot.slane %v1905_v26, %v1204_v20  ;;  %v1210_v25 = vsub.s32 3, %v1899_v24  ;;  %v1731_v24 = vld [vmem:[%s2143_s6 + $0x30] sm:$0xff]  }
 0x561   :  { %v1601_v27 = vpop.f32.mrf.mxu1  ;;  %v1607_v28 = vpop.f32.mrf.mxu0 }
 0x563   :  { %v1024_v29 = vpop.f32.mrf.mxu1  ;;  %v1070_v30 = vpop.f32.mrf.mxu0 }
 0x564   :  { %v1719_v31 = vpack.i.bf16 %v1070_v30, %v1024_v29  ;;  %v1211_v30 = vrot.slane %v1905_v26, %v1210_v25  ;;  %v1732_v26 = vld [vmem:[%s2143_s6 + $0x28] sm:$0xff]  }
 0x565   :  { %v1612_v32 = vpop.f32.mrf.mxu1  ;;  %v1618_v33 = vpop.f32.mrf.mxu0 }
 0x566   :  { %1720 = vrot.lane.b32.xlu1 %v1719_v31, %s1819_s4  ;;  %s1418_s4 = sshll.u32 %s1820_s29, 4  ;;  %s1419_s4 = int_to_ptr.vmem [resolvable:$true] %s1418_s4 }
 0x567   :  { %v1027_v34 = vpop.f32.mrf.mxu1  ;;  %v1073_v35 = vpop.f32.mrf.mxu0  ;;  %s1782_s30 = scalar_lea.vmem %s1419_s4, 256  ;;  %p1787_p1 = scmp.lt.s32.totalorder %s1419_s4, %s1419_s4 }
 0x568   :  { %v1730_v35 = vld [vmem:[%s2143_s6 + $0x38] sm:$0xff]   ;;  %p1783_p0 = scmp.ne.s32.totalorder %s1419_s4, %s1782_s30  ;;  %p1788_p2 = scmp.lt.s32.totalorder %s1782_s30, %s1782_s30 }
 0x569   :  { %v1613_v36 = vpop.f32.mrf.mxu1  ;;  %v1619_v37 = vpop.f32.mrf.mxu0 }
 0x56a   :  { %v1733_v36 = vld [vmem:[%s2143_s6 + $0x20] sm:$0xff]   ;;  %v1734_v37 = vld [vmem:[%s2143_s6 + $0x18] sm:$0xff]   ;;  %p1789_p3 = por %p1788_p2, %p1787_p1 }
 0x56c   :  { %p1790_p4 = pnand %p1789_p3, %p1783_p0 }
 0x5c8   :  { %v1711_v38 = vpop.permute.xlu1 %1710 }
 0x5c9   :  { %v1713_v40 = vunpack.i.h.bf16 %v1711_v38  ;;  %v1712_v41 = vunpack.i.l.bf16 %v1711_v38  ;;  %v1735_v38 = vld [vmem:[%s2143_s6 + $0x10] sm:$0xff]  }
 0x5cb   :  { %v1101_v45 = vsel %vm234_vm2, %v794_v3, %v1713_v40  ;;  %v1100_v47 = vsel %vm234_vm2, %v748_v62, %v1712_v41  ;;  %v1737_v40 = vld [vmem:[%s2143_s6] sm:$0xff]  }
 0x5cc   :  { %v1453_v41 = vld [vmem:[%s2144_s7 + $0x1] ss:$0 sm:$0xff] }
 0x5d0   :  { %v1716_v39 = vpop.permute.xlu1 %1715 }
 0x5d1   :  { %v1718_v42 = vunpack.i.h.bf16 %v1716_v39  ;;  %v1717_v43 = vunpack.i.l.bf16 %v1716_v39  ;;  %v1736_v39 = vld [vmem:[%s2143_s6 + $0x8] sm:$0xff]  }
 0x5d3   :  { %v1104_v50 = vsel %vm1102_vm4, %v1101_v45, %v1718_v42  ;;  %v1103_v51 = vsel %vm1102_vm4, %v1100_v47, %v1717_v43 }
 0x5d8   :  { %v1721_v44 = vpop.permute.xlu1 %1720 }
 0x5d9   :  { %v1723_v48 = vunpack.i.h.bf16 %v1721_v44  ;;  %v1722_v49 = vunpack.i.l.bf16 %v1721_v44 }
 0x5db   :  { %v1107_v52 = vsel %vm1105_vm5, %v1104_v50, %v1723_v48  ;;  %v1106_v53 = vsel %vm1105_vm5, %v1103_v51, %v1722_v49 }
 0x5dc   :  { %v1108_v54 = vpack.c.bf16 %v1107_v52, %v1106_v53 }
 0x5de   :  { %1625 = vmatmul.mubr.msk.bf16.vlgmr.msra.gmra.mxu1 %vm34_vm0, %v1108_v54 }
 0x5df   :  { %1652 = vmatprep.mubr.msk.bf16.mxu1 %vm1805_vm1, %v1804_v15  ;;  %1637 = vmatpush3.bf16.msra.mxu1 %v1730_v35 }
 0x5e0   :  { %1638 = vmatprep.subr.bf16.mxu1 %v1804_v15 }
 0x5e3   :  { %1639 = vmatpush3.bf16.msra.mxu1 %v1731_v24 }
 0x5e4   :  { %1640 = vmatprep.subr.bf16.mxu1 %v1804_v15 }
 0x5e7   :  { %1641 = vmatpush3.bf16.msra.mxu1 %v1732_v26 }
 0x5e8   :  { %1642 = vmatprep.subr.bf16.mxu1 %v1804_v15 }
 0x5eb   :  { %1643 = vmatpush3.bf16.msra.mxu1 %v1733_v36 }
 0x5ec   :  { %1644 = vmatprep.subr.bf16.mxu1 %v1804_v15 }
 0x5ef   :  { %1645 = vmatpush3.bf16.msra.mxu1 %v1734_v37 }
 0x5f0   :  { %1646 = vmatprep.subr.bf16.mxu1 %v1804_v15 }
 0x5f3   :  { %1647 = vmatpush3.bf16.msra.mxu1 %v1735_v38 }
 0x5f4   :  { %1648 = vmatprep.subr.bf16.mxu1 %v1804_v15 }
 0x5f7   :  { %1649 = vmatpush3.bf16.msra.mxu1 %v1736_v39 }
 0x5f8   :  { %1650 = vmatprep.subr.bf16.mxu1 %v1804_v15 }
 0x5fb   :  { %1651 = vmatpush3.bf16.msra.mxu1 %v1737_v40 }
 0x69e   :  { %v1167_v56 = vpop.f32.mrf.mxu1 }
 0x69f   :  { %v1168_v57 = vadd.f32 %v1449_v55, %v1167_v56 }
 0x6a0   :  { %v1626_v58 = vpop.f32.mrf.mxu1 }
 0x6a1   :  { %v2067_v59 = vadd.f32 %v1168_v57, %v1870_v0 }
 0x6a2   :  { %v1170_v60 = vpop.f32.mrf.mxu1 }
 0x6a3   :  { %v1171_v62 = vadd.f32 %v1449_v55, %v1170_v60  ;;  %v1176_v61 = vsel %vm34_vm0, %v2067_v59, 0.0 }
 0x6a4   :  { %1177 = vadd.xlane.f32.xlu0 %v1176_v61  ;;  %v1627_v63 = vpop.f32.mrf.mxu1 }
 0x6a5   :  { %v2072_v2 = vadd.f32 %v1171_v62, %v1875_v1 }
 0x6a7   :  { %v1179_v3 = vsel %vm34_vm0, %v2072_v2, 0.0 }
 0x6a8   :  { %1180 = vadd.xlane.f32.xlu1 %v1179_v3 }
 0x72d   :  { %v1178_v4 = vpop.xlane.xlu0 %1177 }
 0x72e   :  { %v1182_v5 = vmul.f32 0.03125, %v1178_v4 }
 0x730   :  { %v1184_v6 = vsub.f32 %v2067_v59, %v1182_v5 }
 0x731   :  { %v1181_v0 = vpop.xlane.xlu1 %1180 }
 0x732   :  { %v1183_v7 = vmul.f32 0.03125, %v1181_v0  ;;  %v1186_v8 = vmul.f32 %v1184_v6, %v1184_v6  ;;  %v1457_v0 = vld [vmem:[%s2144_s7 + $0x2] ss:$0 sm:$0xff] }
 0x734   :  { %v1185_v9 = vsub.f32 %v2072_v2, %v1183_v7  ;;  %v1188_v10 = vsel %vm34_vm0, %v1186_v8, 0.0 }
 0x735   :  { %1189 = vadd.xlane.f32.xlu0 %v1188_v10 }
 0x736   :  { %v1187_v11 = vmul.f32 %v1185_v9, %v1185_v9 }
 0x738   :  { %v1191_v1 = vsel %vm34_vm0, %v1187_v11, 0.0 }
 0x739   :  { %1192 = vadd.xlane.f32.xlu0 %v1191_v1 }
 0x7be   :  { %v1190_v46 = vpop.xlane.xlu0 %1189 }
 0x7bf   :  { %v1194_v14 = vmul.f32 0.03125, %v1190_v46 }
 0x7c1   :  { %v1196_v16 = vadd.f32 1e-05, %v1194_v14 }
 0x7c2   :  { %v1193_v17 = vpop.xlane.xlu0 %1192 }
 0x7c3   :  { %1774 = vrsqrt.f32 %v1196_v16  ;;  %v1195_v18 = vmul.f32 0.03125, %v1193_v17 }
 0x7c5   :  { %v1197_v19 = vadd.f32 1e-05, %v1195_v18 }
 0x7c7   :  { %1776 = vrsqrt.f32 %v1197_v19 }
 0x7d0   :  { %v1775_v21 = vpop.eup %1774 }
 0x7d1   :  { %v1200_v22 = vmul.f32 %v1775_v21, %v1184_v6 }
 0x7d3   :  { %v1206_v29 = vmul.f32 %v1205_v23, %v1200_v22 }
 0x7d4   :  { %v1777_v27 = vpop.eup %1776 }
 0x7d5   :  { %v1201_v28 = vmul.f32 %v1777_v27, %v1185_v9  ;;  %v1212_v32 = vadd.f32 %v1211_v30, %v1206_v29 }
 0x7d7   :  { %v1207_v31 = vmul.f32 %v1205_v23, %v1201_v28 }
 0x7d9   :  { %v1213_v33 = vadd.f32 %v1211_v30, %v1207_v31 }
 0x7db   :  { %v1214_v34 = vpack.c.bf16 %v1213_v33, %v1212_v32 }
 0x7dd   :  { %1633 = vmatmul.mubr.msk.bf16.vlgmr.msra.gmra.mxu0 %vm34_vm0, %v1214_v34 }
 0x89d   :  { %v1273_v42 = vpop.f32.mrf.mxu0 }
 0x89e   :  { %v1274_v43 = vadd.f32 %v1453_v41, %v1273_v42 }
 0x89f   :  { %v1634_v44 = vpop.f32.mrf.mxu0 }
 0x8a0   :  { %v1282_v45 = vmul.f32 0.044715, %v1274_v43  ;;  %v1280_v61 = vmul.f32 0.5, %v1274_v43 }
 0x8a1   :  { %v1276_v47 = vpop.f32.mrf.mxu0 }
 0x8a2   :  { %v1284_v48 = vmul.f32 %v1282_v45, %v1274_v43  ;;  %v1277_v49 = vadd.f32 %v1453_v41, %v1276_v47 }
 0x8a3   :  { %v1635_v50 = vpop.f32.mrf.mxu0 }
 0x8a4   :  { %v1286_v51 = vmul.f32 %v1284_v48, %v1274_v43  ;;  %v1283_v52 = vmul.f32 0.044715, %v1277_v49  ;;  %v1281_v63 = vmul.f32 0.5, %v1277_v49 }
 0x8a6   :  { %v1288_v53 = vadd.f32 %v1286_v51, %v1274_v43  ;;  %v1285_v54 = vmul.f32 %v1283_v52, %v1277_v49 }
 0x8a8   :  { %v1290_v55 = vmul.f32 0.7978846, %v1288_v53  ;;  %v1287_v56 = vmul.f32 %v1285_v54, %v1277_v49 }
 0x8aa   :  { %1778 = vtanh.f32 %v1290_v55  ;;  %v1289_v15 = vadd.f32 %v1287_v56, %v1277_v49 }
 0x8ac   :  { %v1291_v57 = vmul.f32 0.7978846, %v1289_v15 }
 0x8ae   :  { %1780 = vtanh.f32 %v1291_v57 }
 0x8b7   :  { %v1779_v58 = vpop.eup %1778 }
 0x8b8   :  { %v1294_v60 = vadd.f32 1.0, %v1779_v58 }
 0x8ba   :  { %v1296_v4 = vmul.f32 %v1294_v60, %v1280_v61 }
 0x8bb   :  { %v1781_v62 = vpop.eup %1780 }
 0x8bc   :  { %v1295_v3 = vadd.f32 1.0, %v1781_v62 }
 0x8be   :  { %v1297_v5 = vmul.f32 %v1295_v3, %v1281_v63 }
 0x8c0   :  { %v1298_v6 = vpack.c.bf16 %v1297_v5, %v1296_v4 }
 0x8c2   :  { %1653 = vmatmul.mubr.bf16.vlgmr.msra.gmra.mxu1 %v1298_v6 }
 0x982   :  { %v1402_v7 = vpop.f32.mrf.mxu1 }
 0x983   :  { %v1403_v8 = vadd.f32 %v1457_v0, %v1402_v7 }
 0x984   :  { %v1654_v9 = vpop.f32.mrf.mxu1 }
 0x985   :  { %v1409_v10 = vadd.f32 %v1403_v8, %v2067_v59 }
 0x986   :  { %v1405_v11 = vpop.f32.mrf.mxu1 }
 0x987   :  { %1411 = vst.msk [vmem:[#allocation2] sm:$0xff] %vm34_vm0, %v1409_v10  ;;  %v1406_v1 = vadd.f32 %v1457_v0, %v1405_v11 }
 0x988   :  { %v1655_v12 = vpop.f32.mrf.mxu1 }
 0x989   :  { %v1410_v13 = vadd.f32 %v1406_v1, %v2072_v2 }
 0x98b   :  { %1412 = vst.msk [vmem:[#allocation2 + $0x8] sm:$0xff] %vm34_vm0, %v1410_v13 }
 0x98c   :  { %1793 = shalt.err (!%p1790_p4)
}
 0x98d   :  { %s1821_s7 = smov 128  }
 0x98e   :  { %1424 = dma.vmem_to_hbm [thread:$0]  %s1419_s4, 256, %s2145_s8, [#allocation3], %s1821_s7, %s1821_s7, %s1817_s26  }
 0x98f   :  { %1802 = dma.done.wait [#allocation3], 256  }
 0x990   :  { %1803 = vsyncadd [#allocation3], 4294967040 }
 0x991   :  { %1428 = vsyncpa [#allocation3], 1 }

</bundles_post_ra>
